<compile_context>
chip_gen: v7x
topology: tpu7x:2x2x1
jax: 0.10.0
libtpu: 0.0.40
codegen_flags: <defaults>
</compile_context>

<pallas_src>
import jax
import jax.numpy as jnp
from jax import lax
from jax.experimental import pallas as pl
from jax.experimental.pallas import tpu as pltpu


def rnn_recurrence_kernel(x_ref, wih_ref, bih_ref, comb_ref):
    """Runs T_CHUNK recurrence steps; comb_ref (the output) holds cat(x_t, h).

    x_ref:    (B, T_CHUNK, E)        f32
    wih_ref:  (T_CHUNK, E+H, H)      bf16   (K-packed [Wx; Wh])
    bih_ref:  (T_CHUNK, H)           f32
    comb_ref: (B, E+H)               f32    output; resident across the grid
    """
    E = x_ref.shape[-1]
    t_chunk = x_ref.shape[1]
    not_last_chunk = pl.program_id(0) + 1 < pl.num_programs(0)

    # Zero the hidden half of the resident combined buffer on the first chunk.
    @pl.when(pl.program_id(0) == 0)
    def _():
        comb_ref[:, E:] = jnp.zeros(
            (comb_ref.shape[0], comb_ref.shape[1] - E), comb_ref.dtype)

    def i2h_update(tt):
        # combined = cat(x_t, h_{t-1}) is already staged in comb_ref.
        combined = comb_ref[...]
        # bf16 x bf16 MXU dot, f32 accumulation; state stays f32 in VMEM.
        h_new = (jnp.dot(combined.astype(jnp.bfloat16), wih_ref[tt],
                         preferred_element_type=jnp.float32)
                 + bih_ref[tt:tt + 1, :])
        comb_ref[:, E:] = h_new

    # Static unroll over the chunk (small T_CHUNK; indices stay static).
    for tt in range(t_chunk):
        comb_ref[:, :E] = x_ref[:, tt, :]
        if tt + 1 < t_chunk:
            i2h_update(tt)
        else:
            # Last token of the chunk: only update hidden if another chunk
            # follows. On the globally-last token the i2h result is unused and
            # comb_ref must keep cat(x_last, h_prev) for the epilogue.
            pl.when(not_last_chunk)(lambda: i2h_update(tt))


def rnn_epilogue_kernel(comb_ref, wio_ref, ogb_ref, out_ref):
    """out = LayerNorm(Dropout(i2o(combined))) for the last token only.

    comb_ref: (B, E+H) f32, wio_ref: (E+H, E) bf16,
    ogb_ref: (3, E) f32 = [bio; gamma; beta], out_ref: (B, E) f32.
    """
    out = jnp.dot(comb_ref[...].astype(jnp.bfloat16), wio_ref[...],
                  preferred_element_type=jnp.float32)
    out = out + ogb_ref[0:1, :]                       # i2o bias
    # Dropout(p=0.1) in eval mode is the identity.
    # TODO(synk): training-mode stochastic dropout not implemented.
    mean = jnp.mean(out, axis=-1, keepdims=True)
    var = jnp.mean((out - mean) ** 2, axis=-1, keepdims=True)
    out = (out - mean) * lax.rsqrt(var + 1e-5)        # LayerNorm(E), eps=1e-5
    out = out * ogb_ref[1:2, :] + ogb_ref[2:3, :]     # gamma, beta
    out_ref[...] = out.astype(out_ref.dtype)


def layer_rnn(x, params):
    """x: (batch, token, embed) f32 -> (batch, embed) f32."""
    B, T, E = x.shape
    H = params["bih"].shape[-1]

    # Token chunk per grid step (amortizes per-step overhead; keeps the
    # (8,128) rule on x's block in the original (B,T,E) layout).
    t_chunk = T if T <= 16 else 8
    assert T % t_chunk == 0, (T, t_chunk)
    num_chunks = T // t_chunk

    # Phase 1: the recurrence. Output is the LAST token's `combined`
    # (resident in VMEM across the whole grid, written back once).
    combined = pl.pallas_call(
        rnn_recurrence_kernel,
        out_shape=jax.ShapeDtypeStruct((B, E + H), jnp.float32),
        grid_spec=pltpu.PrefetchScalarGridSpec(
            num_scalar_prefetch=0,
            grid=(num_chunks,),
            in_specs=[
                pl.BlockSpec((B, t_chunk, E), lambda c: (0, c, 0)),      # x
                pl.BlockSpec((t_chunk, E + H, H), lambda c: (c, 0, 0)),  # Wih
                pl.BlockSpec((t_chunk, H), lambda c: (c, 0)),            # bih
            ],
            out_specs=pl.BlockSpec((B, E + H), lambda c: (0, 0)),
        ),
        # Sequential recurrence over token chunks. (v7x: add a leading
        # "parallel" batch-tile axis — the out index_map must then depend on
        # it — and set vmem_limit_bytes / tile H at realistic sizes.)
        compiler_params=pltpu.CompilerParams(
            dimension_semantics=("arbitrary",)),
    )(x, params["wih"], params["bih"])

    # Phase 2: one-shot i2o + LayerNorm epilogue (Wio never sits in VMEM
    # during the recurrence loop). All operands fit in VMEM; no grid.
    out = pl.pallas_call(
        rnn_epilogue_kernel,
        out_shape=jax.ShapeDtypeStruct((B, E), jnp.float32),
    )(combined, params["wio_last"], params["ogb"])
    return out


def init_params(key, n_token, embed_dim, hidden_dim):
    """Per-token HiddenRNN parameters, PyTorch-Linear-style uniform init.

    Linear weights are stored transposed (for y = x @ W), K-packed as
    [W_x; W_h], and kept in bfloat16 (HBM-bandwidth bound; MXU dots are
    bf16 x bf16 with f32 accumulation). Kernel-ready packed blocks
    (wio_last, ogb) are prepared ONCE here, not in the per-call wrapper.
    """
    keys = jax.random.split(key, 4)
    fan_in = embed_dim + hidden_dim
    bound = 1.0 / jnp.sqrt(jnp.float32(fan_in))

    def u(k, shape, dtype=jnp.float32):
        return jax.random.uniform(k, shape, jnp.float32, -bound, bound).astype(dtype)

    params = {
        # i2h: Linear(E+H -> H) per token, packed along K.
        "wih": u(keys[0], (n_token, embed_dim + hidden_dim, hidden_dim),
                 jnp.bfloat16),
        "bih": u(keys[1], (n_token, hidden_dim)),                       # 2-D
        # i2o: Linear(E+H -> E) per token, packed along K.
        "wio": u(keys[2], (n_token, embed_dim + hidden_dim, embed_dim),
                 jnp.bfloat16),
        "bio": u(keys[3], (n_token, embed_dim)),                        # 2-D
        # LayerNorm(E) default affine params.
        "gamma": jnp.ones((n_token, embed_dim), jnp.float32),
        "beta": jnp.zeros((n_token, embed_dim), jnp.float32),
    }
    # Kernel-ready, hoisted out of the forward wrapper:
    params["wio_last"] = params["wio"][-1]                              # (E+H, E) bf16
    params["ogb"] = jnp.concatenate(
        [params["bio"][-1:], params["gamma"][-1:], params["beta"][-1:]],
        axis=0)                                                         # (3, E) f32
    return params


def layer_rnn_ref(x, params):
    """Pure-JAX reference mirroring the forward (eval mode), same precision
    recipe as the kernel: bf16 x bf16 dots with f32 accumulation, f32 state."""
    B, T, E = x.shape
    H = params["bih"].shape[-1]
    h = jnp.zeros((B, H), jnp.float32)
    out = None
    for t in range(T):
        comb = jnp.concatenate([x[:, t, :], h], axis=-1)
        comb_bf = comb.astype(jnp.bfloat16)
        h = (jnp.dot(comb_bf, params["wih"][t],
                     preferred_element_type=jnp.float32)
             + params["bih"][t])
        o = (jnp.dot(comb_bf, params["wio"][t],
                     preferred_element_type=jnp.float32)
             + params["bio"][t])
        mean = o.mean(-1, keepdims=True)
        var = ((o - mean) ** 2).mean(-1, keepdims=True)
        o = (o - mean) / jnp.sqrt(var + 1e-5)
        o = o * params["gamma"][t] + params["beta"][t]
        out = o
    return out


if __name__ == "__main__":
    B, T, E, H = 2, 8, 32, 32   # batch, n_token, embedding_dim, hidden_dim

    key = jax.random.PRNGKey(0)
    kx, kp = jax.random.split(key)
    x = jax.random.normal(kx, (B, T, E), jnp.float32)
    params = init_params(kp, T, E, H)

    fwd = jax.jit(layer_rnn)
    out = jax.block_until_ready(fwd(x, params))
    ref = layer_rnn_ref(x, params)

    assert out.shape == (B, E), out.shape
    assert jnp.allclose(out, ref, rtol=1e-3, atol=1e-3), (
        float(jnp.max(jnp.abs(out - ref))))
    print("KERNEL_OK")
</pallas_src>

<mosaic_0001>
module attributes {stable_mosaic.version = 11 : i64} {
  func.func @rnn_recurrence_kernel(%arg0: i32, %arg1: memref<2x8x32xf32, #tpu.memory_space<vmem>>, %arg2: memref<8x64x32xbf16, #tpu.memory_space<vmem>>, %arg3: memref<8x32xf32, #tpu.memory_space<vmem>>, %arg4: memref<2x64xf32, #tpu.memory_space<vmem>>) attributes {dimension_semantics = [#tpu.dimension_semantics<arbitrary>], iteration_bounds = array<i64: 1>, scalar_prefetch = 0 : i64, scratch_operands = 0 : i64, tpu.core_type = #tpu.core_type<tc>, window_params = [{transform_indices = @transform_0, window_bounds = array<i64: 2, 8, 32>}, {transform_indices = @transform_1, window_bounds = array<i64: 8, 64, 32>}, {transform_indices = @transform_2, window_bounds = array<i64: 8, 32>}, {pipeline_mode = #tpu.pipeline_mode<synchronous>, transform_indices = @transform_3, window_bounds = array<i64: 2, 64>}]} {
    %c1_i32 = arith.constant 1 : i32
    %0 = arith.addi %arg0, %c1_i32 : i32
    %c1_i32_0 = arith.constant 1 : i32
    %1 = arith.cmpi slt, %0, %c1_i32_0 : i32
    %c0_i32 = arith.constant 0 : i32
    %2 = arith.cmpi eq, %arg0, %c0_i32 : i32
    %3 = arith.extui %2 : i1 to i32
    %c0_i32_1 = arith.constant 0 : i32
    %4 = arith.cmpi ne, %3, %c0_i32_1 : i32
    scf.if %4 {
      %cst_103 = arith.constant 0.000000e+00 : f32
      %94 = vector.broadcast %cst_103 : f32 to vector<2x32xf32>
      %c0_104 = arith.constant 0 : index
      %c32_105 = arith.constant 32 : index
      %95 = vector.load %arg4[%c0_104, %c32_105] : memref<2x64xf32, #tpu.memory_space<vmem>>, vector<2x32xf32>
      tpu.vector_store %arg4[%c0_104, %c32_105], %94 {strides = array<i32>} : memref<2x64xf32, #tpu.memory_space<vmem>>, vector<2x32xf32>,
    } else {
    }
    %c0 = arith.constant 0 : index
    %c0_2 = arith.constant 0 : index
    %c0_3 = arith.constant 0 : index
    %5 = vector.load %arg1[%c0, %c0_2, %c0_3] : memref<2x8x32xf32, #tpu.memory_space<vmem>>, vector<2x1x32xf32>
    %6 = vector.shape_cast %5 : vector<2x1x32xf32> to vector<2x32xf32>
    %c0_4 = arith.constant 0 : index
    %c0_5 = arith.constant 0 : index
    %7 = vector.load %arg4[%c0_4, %c0_5] : memref<2x64xf32, #tpu.memory_space<vmem>>, vector<2x32xf32>
    tpu.vector_store %arg4[%c0_4, %c0_5], %6 {strides = array<i32>} : memref<2x64xf32, #tpu.memory_space<vmem>>, vector<2x32xf32>,
    %c0_6 = arith.constant 0 : index
    %c0_7 = arith.constant 0 : index
    %8 = vector.load %arg4[%c0_6, %c0_7] : memref<2x64xf32, #tpu.memory_space<vmem>>, vector<2x64xf32>
    %9 = arith.truncf %8 : vector<2x64xf32> to vector<2x64xbf16>
    %c0_8 = arith.constant 0 : index
    %c0_9 = arith.constant 0 : index
    %c0_10 = arith.constant 0 : index
    %10 = vector.load %arg2[%c0_8, %c0_9, %c0_10] : memref<8x64x32xbf16, #tpu.memory_space<vmem>>, vector<1x64x32xbf16>
    %11 = vector.shape_cast %10 : vector<1x64x32xbf16> to vector<64x32xbf16>
    %cst = arith.constant dense<0.000000e+00> : vector<2x32xf32>
    %12 = tpu.matmul %9, %11, %cst {dimension_numbers = #tpu.dot_dimension_numbers<[1], [0], [0], [1], [0, 0, 1, 1], [], []>} : vector<2x64xbf16>, vector<64x32xbf16>, vector<2x32xf32> -> vector<2x32xf32>
    %c0_11 = arith.constant 0 : index
    %c0_12 = arith.constant 0 : index
    %13 = vector.load %arg3[%c0_11, %c0_12] : memref<8x32xf32, #tpu.memory_space<vmem>>, vector<1x32xf32>
    %14 = vector.broadcast %13 : vector<1x32xf32> to vector<2x32xf32>
    %15 = arith.addf %12, %14 : vector<2x32xf32>
    %c0_13 = arith.constant 0 : index
    %c32 = arith.constant 32 : index
    %16 = vector.load %arg4[%c0_13, %c32] : memref<2x64xf32, #tpu.memory_space<vmem>>, vector<2x32xf32>
    tpu.vector_store %arg4[%c0_13, %c32], %15 {strides = array<i32>} : memref<2x64xf32, #tpu.memory_space<vmem>>, vector<2x32xf32>,
    %c0_14 = arith.constant 0 : index
    %c1 = arith.constant 1 : index
    %c0_15 = arith.constant 0 : index
    %17 = vector.load %arg1[%c0_14, %c1, %c0_15] : memref<2x8x32xf32, #tpu.memory_space<vmem>>, vector<2x1x32xf32>
    %18 = vector.shape_cast %17 : vector<2x1x32xf32> to vector<2x32xf32>
    %c0_16 = arith.constant 0 : index
    %c0_17 = arith.constant 0 : index
    %19 = vector.load %arg4[%c0_16, %c0_17] : memref<2x64xf32, #tpu.memory_space<vmem>>, vector<2x32xf32>
    tpu.vector_store %arg4[%c0_16, %c0_17], %18 {strides = array<i32>} : memref<2x64xf32, #tpu.memory_space<vmem>>, vector<2x32xf32>,
    %c0_18 = arith.constant 0 : index
    %c0_19 = arith.constant 0 : index
    %20 = vector.load %arg4[%c0_18, %c0_19] : memref<2x64xf32, #tpu.memory_space<vmem>>, vector<2x64xf32>
    %21 = arith.truncf %20 : vector<2x64xf32> to vector<2x64xbf16>
    %c1_20 = arith.constant 1 : index
    %c0_21 = arith.constant 0 : index
    %c0_22 = arith.constant 0 : index
    %22 = vector.load %arg2[%c1_20, %c0_21, %c0_22] : memref<8x64x32xbf16, #tpu.memory_space<vmem>>, vector<1x64x32xbf16>
    %23 = vector.shape_cast %22 : vector<1x64x32xbf16> to vector<64x32xbf16>
    %cst_23 = arith.constant dense<0.000000e+00> : vector<2x32xf32>
    %24 = tpu.matmul %21, %23, %cst_23 {dimension_numbers = #tpu.dot_dimension_numbers<[1], [0], [0], [1], [0, 0, 1, 1], [], []>} : vector<2x64xbf16>, vector<64x32xbf16>, vector<2x32xf32> -> vector<2x32xf32>
    %c1_24 = arith.constant 1 : index
    %c0_25 = arith.constant 0 : index
    %25 = vector.load %arg3[%c1_24, %c0_25] : memref<8x32xf32, #tpu.memory_space<vmem>>, vector<1x32xf32>
    %26 = vector.broadcast %25 : vector<1x32xf32> to vector<2x32xf32>
    %27 = arith.addf %24, %26 : vector<2x32xf32>
    %c0_26 = arith.constant 0 : index
    %c32_27 = arith.constant 32 : index
    %28 = vector.load %arg4[%c0_26, %c32_27] : memref<2x64xf32, #tpu.memory_space<vmem>>, vector<2x32xf32>
    tpu.vector_store %arg4[%c0_26, %c32_27], %27 {strides = array<i32>} : memref<2x64xf32, #tpu.memory_space<vmem>>, vector<2x32xf32>,
    %c0_28 = arith.constant 0 : index
    %c2 = arith.constant 2 : index
    %c0_29 = arith.constant 0 : index
    %29 = vector.load %arg1[%c0_28, %c2, %c0_29] : memref<2x8x32xf32, #tpu.memory_space<vmem>>, vector<2x1x32xf32>
    %30 = vector.shape_cast %29 : vector<2x1x32xf32> to vector<2x32xf32>
    %c0_30 = arith.constant 0 : index
    %c0_31 = arith.constant 0 : index
    %31 = vector.load %arg4[%c0_30, %c0_31] : memref<2x64xf32, #tpu.memory_space<vmem>>, vector<2x32xf32>
    tpu.vector_store %arg4[%c0_30, %c0_31], %30 {strides = array<i32>} : memref<2x64xf32, #tpu.memory_space<vmem>>, vector<2x32xf32>,
    %c0_32 = arith.constant 0 : index
    %c0_33 = arith.constant 0 : index
    %32 = vector.load %arg4[%c0_32, %c0_33] : memref<2x64xf32, #tpu.memory_space<vmem>>, vector<2x64xf32>
    %33 = arith.truncf %32 : vector<2x64xf32> to vector<2x64xbf16>
    %c2_34 = arith.constant 2 : index
    %c0_35 = arith.constant 0 : index
    %c0_36 = arith.constant 0 : index
    %34 = vector.load %arg2[%c2_34, %c0_35, %c0_36] : memref<8x64x32xbf16, #tpu.memory_space<vmem>>, vector<1x64x32xbf16>
    %35 = vector.shape_cast %34 : vector<1x64x32xbf16> to vector<64x32xbf16>
    %cst_37 = arith.constant dense<0.000000e+00> : vector<2x32xf32>
    %36 = tpu.matmul %33, %35, %cst_37 {dimension_numbers = #tpu.dot_dimension_numbers<[1], [0], [0], [1], [0, 0, 1, 1], [], []>} : vector<2x64xbf16>, vector<64x32xbf16>, vector<2x32xf32> -> vector<2x32xf32>
    %c2_38 = arith.constant 2 : index
    %c0_39 = arith.constant 0 : index
    %37 = vector.load %arg3[%c2_38, %c0_39] : memref<8x32xf32, #tpu.memory_space<vmem>>, vector<1x32xf32>
    %38 = vector.broadcast %37 : vector<1x32xf32> to vector<2x32xf32>
    %39 = arith.addf %36, %38 : vector<2x32xf32>
    %c0_40 = arith.constant 0 : index
    %c32_41 = arith.constant 32 : index
    %40 = vector.load %arg4[%c0_40, %c32_41] : memref<2x64xf32, #tpu.memory_space<vmem>>, vector<2x32xf32>
    tpu.vector_store %arg4[%c0_40, %c32_41], %39 {strides = array<i32>} : memref<2x64xf32, #tpu.memory_space<vmem>>, vector<2x32xf32>,
    %c0_42 = arith.constant 0 : index
    %c3 = arith.constant 3 : index
    %c0_43 = arith.constant 0 : index
    %41 = vector.load %arg1[%c0_42, %c3, %c0_43] : memref<2x8x32xf32, #tpu.memory_space<vmem>>, vector<2x1x32xf32>
    %42 = vector.shape_cast %41 : vector<2x1x32xf32> to vector<2x32xf32>
    %c0_44 = arith.constant 0 : index
    %c0_45 = arith.constant 0 : index
    %43 = vector.load %arg4[%c0_44, %c0_45] : memref<2x64xf32, #tpu.memory_space<vmem>>, vector<2x32xf32>
    tpu.vector_store %arg4[%c0_44, %c0_45], %42 {strides = array<i32>} : memref<2x64xf32, #tpu.memory_space<vmem>>, vector<2x32xf32>,
    %c0_46 = arith.constant 0 : index
    %c0_47 = arith.constant 0 : index
    %44 = vector.load %arg4[%c0_46, %c0_47] : memref<2x64xf32, #tpu.memory_space<vmem>>, vector<2x64xf32>
    %45 = arith.truncf %44 : vector<2x64xf32> to vector<2x64xbf16>
    %c3_48 = arith.constant 3 : index
    %c0_49 = arith.constant 0 : index
    %c0_50 = arith.constant 0 : index
    %46 = vector.load %arg2[%c3_48, %c0_49, %c0_50] : memref<8x64x32xbf16, #tpu.memory_space<vmem>>, vector<1x64x32xbf16>
    %47 = vector.shape_cast %46 : vector<1x64x32xbf16> to vector<64x32xbf16>
    %cst_51 = arith.constant dense<0.000000e+00> : vector<2x32xf32>
    %48 = tpu.matmul %45, %47, %cst_51 {dimension_numbers = #tpu.dot_dimension_numbers<[1], [0], [0], [1], [0, 0, 1, 1], [], []>} : vector<2x64xbf16>, vector<64x32xbf16>, vector<2x32xf32> -> vector<2x32xf32>
    %c3_52 = arith.constant 3 : index
    %c0_53 = arith.constant 0 : index
    %49 = vector.load %arg3[%c3_52, %c0_53] : memref<8x32xf32, #tpu.memory_space<vmem>>, vector<1x32xf32>
    %50 = vector.broadcast %49 : vector<1x32xf32> to vector<2x32xf32>
    %51 = arith.addf %48, %50 : vector<2x32xf32>
    %c0_54 = arith.constant 0 : index
    %c32_55 = arith.constant 32 : index
    %52 = vector.load %arg4[%c0_54, %c32_55] : memref<2x64xf32, #tpu.memory_space<vmem>>, vector<2x32xf32>
    tpu.vector_store %arg4[%c0_54, %c32_55], %51 {strides = array<i32>} : memref<2x64xf32, #tpu.memory_space<vmem>>, vector<2x32xf32>,
    %c0_56 = arith.constant 0 : index
    %c4 = arith.constant 4 : index
    %c0_57 = arith.constant 0 : index
    %53 = vector.load %arg1[%c0_56, %c4, %c0_57] : memref<2x8x32xf32, #tpu.memory_space<vmem>>, vector<2x1x32xf32>
    %54 = vector.shape_cast %53 : vector<2x1x32xf32> to vector<2x32xf32>
    %c0_58 = arith.constant 0 : index
    %c0_59 = arith.constant 0 : index
    %55 = vector.load %arg4[%c0_58, %c0_59] : memref<2x64xf32, #tpu.memory_space<vmem>>, vector<2x32xf32>
    tpu.vector_store %arg4[%c0_58, %c0_59], %54 {strides = array<i32>} : memref<2x64xf32, #tpu.memory_space<vmem>>, vector<2x32xf32>,
    %c0_60 = arith.constant 0 : index
    %c0_61 = arith.constant 0 : index
    %56 = vector.load %arg4[%c0_60, %c0_61] : memref<2x64xf32, #tpu.memory_space<vmem>>, vector<2x64xf32>
    %57 = arith.truncf %56 : vector<2x64xf32> to vector<2x64xbf16>
    %c4_62 = arith.constant 4 : index
    %c0_63 = arith.constant 0 : index
    %c0_64 = arith.constant 0 : index
    %58 = vector.load %arg2[%c4_62, %c0_63, %c0_64] : memref<8x64x32xbf16, #tpu.memory_space<vmem>>, vector<1x64x32xbf16>
    %59 = vector.shape_cast %58 : vector<1x64x32xbf16> to vector<64x32xbf16>
    %cst_65 = arith.constant dense<0.000000e+00> : vector<2x32xf32>
    %60 = tpu.matmul %57, %59, %cst_65 {dimension_numbers = #tpu.dot_dimension_numbers<[1], [0], [0], [1], [0, 0, 1, 1], [], []>} : vector<2x64xbf16>, vector<64x32xbf16>, vector<2x32xf32> -> vector<2x32xf32>
    %c4_66 = arith.constant 4 : index
    %c0_67 = arith.constant 0 : index
    %61 = vector.load %arg3[%c4_66, %c0_67] : memref<8x32xf32, #tpu.memory_space<vmem>>, vector<1x32xf32>
    %62 = vector.broadcast %61 : vector<1x32xf32> to vector<2x32xf32>
    %63 = arith.addf %60, %62 : vector<2x32xf32>
    %c0_68 = arith.constant 0 : index
    %c32_69 = arith.constant 32 : index
    %64 = vector.load %arg4[%c0_68, %c32_69] : memref<2x64xf32, #tpu.memory_space<vmem>>, vector<2x32xf32>
    tpu.vector_store %arg4[%c0_68, %c32_69], %63 {strides = array<i32>} : memref<2x64xf32, #tpu.memory_space<vmem>>, vector<2x32xf32>,
    %c0_70 = arith.constant 0 : index
    %c5 = arith.constant 5 : index
    %c0_71 = arith.constant 0 : index
    %65 = vector.load %arg1[%c0_70, %c5, %c0_71] : memref<2x8x32xf32, #tpu.memory_space<vmem>>, vector<2x1x32xf32>
    %66 = vector.shape_cast %65 : vector<2x1x32xf32> to vector<2x32xf32>
    %c0_72 = arith.constant 0 : index
    %c0_73 = arith.constant 0 : index
    %67 = vector.load %arg4[%c0_72, %c0_73] : memref<2x64xf32, #tpu.memory_space<vmem>>, vector<2x32xf32>
    tpu.vector_store %arg4[%c0_72, %c0_73], %66 {strides = array<i32>} : memref<2x64xf32, #tpu.memory_space<vmem>>, vector<2x32xf32>,
    %c0_74 = arith.constant 0 : index
    %c0_75 = arith.constant 0 : index
    %68 = vector.load %arg4[%c0_74, %c0_75] : memref<2x64xf32, #tpu.memory_space<vmem>>, vector<2x64xf32>
    %69 = arith.truncf %68 : vector<2x64xf32> to vector<2x64xbf16>
    %c5_76 = arith.constant 5 : index
    %c0_77 = arith.constant 0 : index
    %c0_78 = arith.constant 0 : index
    %70 = vector.load %arg2[%c5_76, %c0_77, %c0_78] : memref<8x64x32xbf16, #tpu.memory_space<vmem>>, vector<1x64x32xbf16>
    %71 = vector.shape_cast %70 : vector<1x64x32xbf16> to vector<64x32xbf16>
    %cst_79 = arith.constant dense<0.000000e+00> : vector<2x32xf32>
    %72 = tpu.matmul %69, %71, %cst_79 {dimension_numbers = #tpu.dot_dimension_numbers<[1], [0], [0], [1], [0, 0, 1, 1], [], []>} : vector<2x64xbf16>, vector<64x32xbf16>, vector<2x32xf32> -> vector<2x32xf32>
    %c5_80 = arith.constant 5 : index
    %c0_81 = arith.constant 0 : index
    %73 = vector.load %arg3[%c5_80, %c0_81] : memref<8x32xf32, #tpu.memory_space<vmem>>, vector<1x32xf32>
    %74 = vector.broadcast %73 : vector<1x32xf32> to vector<2x32xf32>
    %75 = arith.addf %72, %74 : vector<2x32xf32>
    %c0_82 = arith.constant 0 : index
    %c32_83 = arith.constant 32 : index
    %76 = vector.load %arg4[%c0_82, %c32_83] : memref<2x64xf32, #tpu.memory_space<vmem>>, vector<2x32xf32>
    tpu.vector_store %arg4[%c0_82, %c32_83], %75 {strides = array<i32>} : memref<2x64xf32, #tpu.memory_space<vmem>>, vector<2x32xf32>,
    %c0_84 = arith.constant 0 : index
    %c6 = arith.constant 6 : index
    %c0_85 = arith.constant 0 : index
    %77 = vector.load %arg1[%c0_84, %c6, %c0_85] : memref<2x8x32xf32, #tpu.memory_space<vmem>>, vector<2x1x32xf32>
    %78 = vector.shape_cast %77 : vector<2x1x32xf32> to vector<2x32xf32>
    %c0_86 = arith.constant 0 : index
    %c0_87 = arith.constant 0 : index
    %79 = vector.load %arg4[%c0_86, %c0_87] : memref<2x64xf32, #tpu.memory_space<vmem>>, vector<2x32xf32>
    tpu.vector_store %arg4[%c0_86, %c0_87], %78 {strides = array<i32>} : memref<2x64xf32, #tpu.memory_space<vmem>>, vector<2x32xf32>,
    %c0_88 = arith.constant 0 : index
    %c0_89 = arith.constant 0 : index
    %80 = vector.load %arg4[%c0_88, %c0_89] : memref<2x64xf32, #tpu.memory_space<vmem>>, vector<2x64xf32>
    %81 = arith.truncf %80 : vector<2x64xf32> to vector<2x64xbf16>
    %c6_90 = arith.constant 6 : index
    %c0_91 = arith.constant 0 : index
    %c0_92 = arith.constant 0 : index
    %82 = vector.load %arg2[%c6_90, %c0_91, %c0_92] : memref<8x64x32xbf16, #tpu.memory_space<vmem>>, vector<1x64x32xbf16>
    %83 = vector.shape_cast %82 : vector<1x64x32xbf16> to vector<64x32xbf16>
    %cst_93 = arith.constant dense<0.000000e+00> : vector<2x32xf32>
    %84 = tpu.matmul %81, %83, %cst_93 {dimension_numbers = #tpu.dot_dimension_numbers<[1], [0], [0], [1], [0, 0, 1, 1], [], []>} : vector<2x64xbf16>, vector<64x32xbf16>, vector<2x32xf32> -> vector<2x32xf32>
    %c6_94 = arith.constant 6 : index
    %c0_95 = arith.constant 0 : index
    %85 = vector.load %arg3[%c6_94, %c0_95] : memref<8x32xf32, #tpu.memory_space<vmem>>, vector<1x32xf32>
    %86 = vector.broadcast %85 : vector<1x32xf32> to vector<2x32xf32>
    %87 = arith.addf %84, %86 : vector<2x32xf32>
    %c0_96 = arith.constant 0 : index
    %c32_97 = arith.constant 32 : index
    %88 = vector.load %arg4[%c0_96, %c32_97] : memref<2x64xf32, #tpu.memory_space<vmem>>, vector<2x32xf32>
    tpu.vector_store %arg4[%c0_96, %c32_97], %87 {strides = array<i32>} : memref<2x64xf32, #tpu.memory_space<vmem>>, vector<2x32xf32>,
    %c0_98 = arith.constant 0 : index
    %c7 = arith.constant 7 : index
    %c0_99 = arith.constant 0 : index
    %89 = vector.load %arg1[%c0_98, %c7, %c0_99] : memref<2x8x32xf32, #tpu.memory_space<vmem>>, vector<2x1x32xf32>
    %90 = vector.shape_cast %89 : vector<2x1x32xf32> to vector<2x32xf32>
    %c0_100 = arith.constant 0 : index
    %c0_101 = arith.constant 0 : index
    %91 = vector.load %arg4[%c0_100, %c0_101] : memref<2x64xf32, #tpu.memory_space<vmem>>, vector<2x32xf32>
    tpu.vector_store %arg4[%c0_100, %c0_101], %90 {strides = array<i32>} : memref<2x64xf32, #tpu.memory_space<vmem>>, vector<2x32xf32>,
    %92 = arith.extui %1 : i1 to i32
    %c0_i32_102 = arith.constant 0 : i32
    %93 = arith.cmpi ne, %92, %c0_i32_102 : i32
    scf.if %93 {
      %c0_103 = arith.constant 0 : index
      %c0_104 = arith.constant 0 : index
      %94 = vector.load %arg4[%c0_103, %c0_104] : memref<2x64xf32, #tpu.memory_space<vmem>>, vector<2x64xf32>
      %95 = arith.truncf %94 : vector<2x64xf32> to vector<2x64xbf16>
      %c7_105 = arith.constant 7 : index
      %c0_106 = arith.constant 0 : index
      %c0_107 = arith.constant 0 : index
      %96 = vector.load %arg2[%c7_105, %c0_106, %c0_107] : memref<8x64x32xbf16, #tpu.memory_space<vmem>>, vector<1x64x32xbf16>
      %97 = vector.shape_cast %96 : vector<1x64x32xbf16> to vector<64x32xbf16>
      %cst_108 = arith.constant dense<0.000000e+00> : vector<2x32xf32>
      %98 = tpu.matmul %95, %97, %cst_108 {dimension_numbers = #tpu.dot_dimension_numbers<[1], [0], [0], [1], [0, 0, 1, 1], [], []>} : vector<2x64xbf16>, vector<64x32xbf16>, vector<2x32xf32> -> vector<2x32xf32>
      %c7_109 = arith.constant 7 : index
      %c0_110 = arith.constant 0 : index
      %99 = vector.load %arg3[%c7_109, %c0_110] : memref<8x32xf32, #tpu.memory_space<vmem>>, vector<1x32xf32>
      %100 = vector.broadcast %99 : vector<1x32xf32> to vector<2x32xf32>
      %101 = arith.addf %98, %100 : vector<2x32xf32>
      %c0_111 = arith.constant 0 : index
      %c32_112 = arith.constant 32 : index
      %102 = vector.load %arg4[%c0_111, %c32_112] : memref<2x64xf32, #tpu.memory_space<vmem>>, vector<2x32xf32>
      tpu.vector_store %arg4[%c0_111, %c32_112], %101 {strides = array<i32>} : memref<2x64xf32, #tpu.memory_space<vmem>>, vector<2x32xf32>,
    } else {
    }
    return
  }
  func.func @transform_0(%arg0: i32) -> (i32, i32, i32) {
    %c0_i32 = arith.constant 0 : i32
    %c0_i32_0 = arith.constant 0 : i32
    %c0_i32_1 = arith.constant 0 : i32
    return %c0_i32, %arg0, %c0_i32_0 : i32, i32, i32
  }
  func.func @transform_1(%arg0: i32) -> (i32, i32, i32) {
    %c0_i32 = arith.constant 0 : i32
    %c0_i32_0 = arith.constant 0 : i32
    %c0_i32_1 = arith.constant 0 : i32
    return %arg0, %c0_i32, %c0_i32_0 : i32, i32, i32
  }
  func.func @transform_2(%arg0: i32) -> (i32, i32) {
    %c0_i32 = arith.constant 0 : i32
    %c0_i32_0 = arith.constant 0 : i32
    return %arg0, %c0_i32 : i32, i32
  }
  func.func @transform_3(%arg0: i32) -> (i32, i32) {
    %c0_i32 = arith.constant 0 : i32
    %c0_i32_0 = arith.constant 0 : i32
    %c0_i32_1 = arith.constant 0 : i32
    return %c0_i32, %c0_i32_0 : i32, i32
  }
}

module attributes {stable_mosaic.version = 11 : i64} {
  func.func @rnn_epilogue_kernel(%arg0: memref<2x64xf32, #tpu.memory_space<vmem>>, %arg1: memref<64x32xbf16, #tpu.memory_space<vmem>>, %arg2: memref<3x32xf32, #tpu.memory_space<vmem>>, %arg3: memref<2x32xf32, #tpu.memory_space<vmem>>) attributes {dimension_semantics = [], scalar_prefetch = 0 : i64, scratch_operands = 0 : i64, tpu.core_type = #tpu.core_type<tc>} {
    %c0 = arith.constant 0 : index
    %c0_0 = arith.constant 0 : index
    %0 = vector.load %arg0[%c0, %c0_0] : memref<2x64xf32, #tpu.memory_space<vmem>>, vector<2x64xf32>
    %1 = arith.truncf %0 : vector<2x64xf32> to vector<2x64xbf16>
    %c0_1 = arith.constant 0 : index
    %c0_2 = arith.constant 0 : index
    %2 = vector.load %arg1[%c0_1, %c0_2] : memref<64x32xbf16, #tpu.memory_space<vmem>>, vector<64x32xbf16>
    %cst = arith.constant dense<0.000000e+00> : vector<2x32xf32>
    %3 = tpu.matmul %1, %2, %cst {dimension_numbers = #tpu.dot_dimension_numbers<[1], [0], [0], [1], [0, 0, 1, 1], [], []>} : vector<2x64xbf16>, vector<64x32xbf16>, vector<2x32xf32> -> vector<2x32xf32>
    %c0_3 = arith.constant 0 : index
    %c0_4 = arith.constant 0 : index
    %4 = vector.load %arg2[%c0_3, %c0_4] : memref<3x32xf32, #tpu.memory_space<vmem>>, vector<1x32xf32>
    %5 = vector.broadcast %4 : vector<1x32xf32> to vector<2x32xf32>
    %6 = arith.addf %3, %5 : vector<2x32xf32>
    %cst_5 = arith.constant dense<0.000000e+00> : vector<2xf32>
    %7 = vector.multi_reduction <add>, %6, %cst_5 [1] : vector<2x32xf32> to vector<2xf32>
    %8 = vector.shape_cast %7 : vector<2xf32> to vector<2x1xf32>
    %cst_6 = arith.constant 3.200000e+01 : f32
    %9 = vector.broadcast %cst_6 : f32 to vector<2x1xf32>
    %10 = arith.divf %8, %9 : vector<2x1xf32>
    %11 = vector.broadcast %10 : vector<2x1xf32> to vector<2x32xf32>
    %12 = arith.subf %6, %11 : vector<2x32xf32>
    %13 = arith.mulf %12, %12 : vector<2x32xf32>
    %cst_7 = arith.constant dense<0.000000e+00> : vector<2xf32>
    %14 = vector.multi_reduction <add>, %13, %cst_7 [1] : vector<2x32xf32> to vector<2xf32>
    %15 = vector.shape_cast %14 : vector<2xf32> to vector<2x1xf32>
    %cst_8 = arith.constant 3.200000e+01 : f32
    %16 = vector.broadcast %cst_8 : f32 to vector<2x1xf32>
    %17 = arith.divf %15, %16 : vector<2x1xf32>
    %18 = vector.broadcast %10 : vector<2x1xf32> to vector<2x32xf32>
    %19 = arith.subf %6, %18 : vector<2x32xf32>
    %cst_9 = arith.constant 9.99999974E-6 : f32
    %20 = vector.broadcast %cst_9 : f32 to vector<2x1xf32>
    %21 = arith.addf %17, %20 : vector<2x1xf32>
    %22 = math.rsqrt %21 : vector<2x1xf32>
    %23 = vector.broadcast %22 : vector<2x1xf32> to vector<2x32xf32>
    %24 = arith.mulf %19, %23 : vector<2x32xf32>
    %c1 = arith.constant 1 : index
    %c0_10 = arith.constant 0 : index
    %25 = vector.load %arg2[%c1, %c0_10] : memref<3x32xf32, #tpu.memory_space<vmem>>, vector<1x32xf32>
    %26 = vector.broadcast %25 : vector<1x32xf32> to vector<2x32xf32>
    %27 = arith.mulf %24, %26 : vector<2x32xf32>
    %c2 = arith.constant 2 : index
    %c0_11 = arith.constant 0 : index
    %28 = vector.load %arg2[%c2, %c0_11] : memref<3x32xf32, #tpu.memory_space<vmem>>, vector<1x32xf32>
    %29 = vector.broadcast %28 : vector<1x32xf32> to vector<2x32xf32>
    %30 = arith.addf %27, %29 : vector<2x32xf32>
    %c0_12 = arith.constant 0 : index
    %c0_13 = arith.constant 0 : index
    %31 = vector.load %arg3[%c0_12, %c0_13] : memref<2x32xf32, #tpu.memory_space<vmem>>, vector<2x32xf32>
    tpu.vector_store %arg3[%c0_12, %c0_13], %30 {strides = array<i32>} : memref<2x32xf32, #tpu.memory_space<vmem>>, vector<2x32xf32>,
    return
  }
}

</mosaic_0001>

<bundles_post_ra>
// kernel: layer_rnn.3
= control target key start
LH: loop header
LB: loop body
LE: loop exit
PB: predicated region body
PF: predicated region fallthrough
CT: control target
= control target key end

     0   :  { %v199_v1 = vmov 0.0   ;;  %vm200_vm0 = vmmov 0   ;;  %s261_s0 = inlined_call_operand.vmem [shape: f32[2,64], index: 0, kind: input, shape index: {}]   ;;  %s262_s1 = inlined_call_operand.vmem [shape: bf16[64,32], index: 1, kind: input, shape index: {}]   ;;  %s263_s2 = inlined_call_operand.vmem [shape: f32[3,32], index: 2, kind: input, shape index: {}]   ;;  %s264_s3 = inlined_call_operand.hbm [shape: f32[2,32], index: 3, kind: output, shape index: {}]  }
   0x1   :  { %v169_v0 = vld [vmem:[%s262_s1] sm:$0xff]   ;;  %154 = vmatprep.subr.bf16.mxu0 %v199_v1  ;;  %v170_v2 = vld [vmem:[%s262_s1 + $0x8] sm:$0xff]   ;;  %162 = vmatprep.mubr.msk.bf16.mxu0 %vm200_vm0, %v199_v1 }
   0x2   :  { %155 = vmatpush3.bf16.msra.mxu0 %v169_v0 }
   0x3   :  { %156 = vmatprep.subr.bf16.mxu0 %v199_v1 }
   0x4   :  { %8 = vsyncpa [#allocation3], 0  ;;  %v171_v3 = vld [vmem:[%s262_s1 + $0x10] sm:$0xff]   ;;  %v172_v4 = vld [vmem:[%s262_s1 + $0x18] sm:$0xff]   ;;  %vm55_vm1 = vcmask 523264   ;;  %vm99_vm2 = vcmask 254976  }
   0x5   :  { %v16_v5 = vld [vmem:[%s261_s0] sm:$0x3]  ;;  %v148_v25 = vld [vmem:[%s263_s2 + $0x2] ss:$0 sm:$0xff]  ;;  %s201_s26 = smov [#allocation2]  }
   0x6   :  { %157 = vmatpush3.bf16.msra.mxu0 %v170_v2  ;;  %v17_v6 = vpack.c.bf16 %v16_v5, %v16_v5  ;;  %v141_v7 = vld [vmem:[%s263_s2] ss:$0 sm:$0xff]  ;;  %v147_v23 = vld [vmem:[%s263_s2 + $0x1] ss:$0 sm:$0xff]  ;;  %s133_s27 = sshll.u32 %s201_s26, 4  ;;  %s134_s27 = int_to_ptr.vmem [resolvable:$true] %s133_s27 }
   0x7   :  { %158 = vmatprep.subr.bf16.mxu0 %v199_v1  ;;  %s175_s28 = scalar_lea.vmem %s134_s27, 32  ;;  %p180_p1 = scmp.lt.s32.totalorder %s134_s27, %s134_s27 }
   0x8   :  { %p176_p0 = scmp.ne.s32.totalorder %s134_s27, %s175_s28  ;;  %p181_p2 = scmp.lt.s32.totalorder %s175_s28, %s175_s28 }
   0xa   :  { %159 = vmatpush3.bf16.msra.mxu0 %v171_v3  ;;  %p182_p3 = por %p181_p2, %p180_p1 }
   0xb   :  { %160 = vmatprep.subr.bf16.mxu0 %v199_v1 }
   0xc   :  { %p183_p4 = pnand %p182_p3, %p176_p0 }
   0xe   :  { %161 = vmatpush3.bf16.msra.mxu0 %v172_v4 }
  0x11   :  { %163 = vmatmul.mubr.msk.bf16.vlgmr.msra.gmra.mrb[0].mxu0 %vm55_vm1, %v17_v6 }
  0xe4   :  { %v93_v8 = vpop.f32.mrb[0].mxu0 }
  0xe5   :  { %v94_v9 = vadd.f32 %v141_v7, %v93_v8  ;;  %v164_v10 = vpop.f32.mrb[1].mxu0 }
  0xe6   :  { %v96_v11 = vpop.f32.mrb[2].mxu0 }
  0xe7   :  { %v165_v12 = vpop.f32.mrb[3].mxu0  ;;  %v100_v13 = vsel %vm99_vm2, %v94_v9, 0.0 }
  0xe8   :  { %101 = vadd.xlane.f32.xlu0 %v100_v13 }
 0x175   :  { %v102_v14 = vpop.xlane.xlu0 %101 }
 0x176   :  { %v104_v15 = vmul.f32 0.03125, %v102_v14 }
 0x178   :  { %v105_v16 = vsub.f32 %v94_v9, %v104_v15 }
 0x17a   :  { %v106_v17 = vmul.f32 %v105_v16, %v105_v16 }
 0x17c   :  { %v107_v18 = vsel %vm99_vm2, %v106_v17, 0.0 }
 0x17d   :  { %108 = vadd.xlane.f32.xlu0 %v107_v18 }
 0x20a   :  { %v109_v19 = vpop.xlane.xlu0 %108 }
 0x20b   :  { %v110_v20 = vmul.f32 0.03125, %v109_v19 }
 0x20d   :  { %v111_v21 = vadd.f32 1e-05, %v110_v20 }
 0x20f   :  { %173 = vrsqrt.f32 %v111_v21 }
 0x219   :  { %v174_v22 = vpop.eup %173 }
 0x21a   :  { %v113_v24 = vmul.f32 %v174_v22, %v105_v16 }
 0x21c   :  { %v119_v26 = vmul.f32 %v147_v23, %v113_v24 }
 0x21e   :  { %v125_v27 = vadd.f32 %v148_v25, %v119_v26 }
 0x220   :  { %126 = vst.msk [vmem:[#allocation2] sm:$0x3] %vm99_vm2, %v125_v27 }
 0x221   :  { %186 = shalt.err (!%p183_p4)
}
 0x222   :  { %s187_s4 = scalar_lea.hbm %s264_s3, 32 }
 0x223   :  { %p188_p5 = scmp.ne.s32.totalorder %s264_s3, %s187_s4  ;;  %p191_p6 = scmp.lt.u32.totalorder %s187_s4, %s264_s3 }
 0x225   :  { %p193_p7 = pnand %p191_p6, %p188_p5 }
 0x227   :  { %196 = shalt.err (!%p193_p7)
}
 0x228   :  { %136 = dma.vmem_to_hbm [thread:$0]  %s134_s27, 32, %s264_s3, [#allocation3]  }
 0x229   :  { %197 = dma.done.wait [#allocation3], 32  }
 0x22a   :  { %198 = vsyncadd [#allocation3], 4294967264 }
 0x22b   :  { %140 = vsyncpa [#allocation3], 1 }

// kernel: layer_rnn.2
= control target key start
LH: loop header
LB: loop body
LE: loop exit
PB: predicated region body
PF: predicated region fallthrough
CT: control target
= control target key end

     0   :  { %vm21_vm0 = vcmask 517376   ;;  %v1055_v0 = vmov 0.0   ;;  %vm1056_vm1 = vmmov 0   ;;  %vm28_vm2 = vcmask 1041409   ;;  %s1057_s13 = smov 32   ;;  %s1381_s1 = inlined_call_operand.vmem [shape: bf16[8,64,32], index: 1, kind: input, shape index: {}]   ;;  %s1382_s3 = inlined_call_operand.vmem [shape: f32[2,64], index: 3, kind: output, shape index: {}]   ;;  %s1383_s0 = inlined_call_operand.vmem [shape: f32[2,8,32], index: 0, kind: input, shape index: {}]   ;;  %s1384_s2 = inlined_call_operand.vmem [shape: f32[8,32], index: 2, kind: input, shape index: {}]  }
   0x1   :  { %940 = vmatprep.subr.bf16.mxu0 %v1055_v0  ;;  %v1027_v1 = vld [vmem:[%s1381_s1] sm:$0xff]   ;;  %948 = vmatprep.mubr.msk.bf16.mxu0 %vm1056_vm1, %v1055_v0  ;;  %22 = vst.msk [vmem:[%s1382_s3] sm:$0x3] %vm21_vm0, %v1055_v0  ;;  %v1028_v2 = vld [vmem:[%s1381_s1 + $0x8] sm:$0xff]   ;;  %vm31_vm3 = vcmask 254976   ;;  %v1029_v5 = vld [vmem:[%s1381_s1 + $0x10] sm:$0xff]  }
   0x2   :  { %952 = vmatprep.subr.bf16.mxu1 %v1055_v0  ;;  %960 = vmatprep.mubr.msk.bf16.mxu1 %vm1056_vm1, %v1055_v0  ;;  %v23_v3 = vld [vmem:[%s1383_s0] sm:$0x1]  ;;  %v24_v4 = vld [vmem:[%s1383_s0 + $0x8] sm:$0x1]  ;;  %vm72_vm4 = vcmask 523264   ;;  %v1030_v8 = vld [vmem:[%s1381_s1 + $0x18] sm:$0xff]  }
   0x3   :  { %941 = vmatpush3.bf16.msra.mxu0 %v1027_v1  ;;  %v27_v6 = vrot.slane %v24_v4, 7  ;;  %v1031_v11 = vld [vmem:[%s1381_s1 + $0x20] sm:$0xff]   ;;  %v1032_v12 = vld [vmem:[%s1381_s1 + $0x28] sm:$0xff]   ;;  %v1033_v13 = vld [vmem:[%s1381_s1 + $0x30] sm:$0xff]  }
   0x4   :  { %942 = vmatprep.subr.bf16.mxu0 %v1055_v0  ;;  %953 = vmatpush3.bf16.msra.mxu1 %v1031_v11  ;;  %v1034_v14 = vld [vmem:[%s1381_s1 + $0x38] sm:$0xff]   ;;  %v801_v15 = vld [vmem:[%s1384_s2] ss:$0 sm:$0xff]  ;;  %v123_v21 = vld [vmem:[%s1383_s0 + $0x9] sm:$0x1] }
   0x5   :  { %v29_v7 = vsel %vm28_vm2, %v27_v6, %v23_v3  ;;  %954 = vmatprep.subr.bf16.mxu1 %v1055_v0  ;;  %v126_v22 = vrot.slane %v123_v21, 7  ;;  %v122_v23 = vld [vmem:[%s1383_s0 + $0x1] sm:$0x1]  ;;  %v1036_v29 = vld [vmem:[%s1381_s1 + $0x48] sm:$0xff]   ;;  %v1037_v30 = vld [vmem:[%s1381_s1 + $0x50] sm:$0xff]  }
   0x6   :  { %32 = vst.msk [vmem:[%s1382_s3] sm:$0x3] %vm31_vm3, %v29_v7  ;;  %v1035_v28 = vld [vmem:[%s1381_s1 + $0x40] sm:$0xff]   ;;  %v1038_v31 = vld [vmem:[%s1381_s1 + $0x58] sm:$0xff]   ;;  %v219_v38 = vld [vmem:[%s1383_s0 + $0xa] sm:$0x1] }
   0x7   :  { %943 = vmatpush3.bf16.msra.mxu0 %v1028_v2  ;;  %v127_v24 = vsel %vm28_vm2, %v126_v22, %v122_v23  ;;  %v815_v32 = vld [vmem:[%s1384_s2 + $0x1] ss:$0 sm:$0xff]  ;;  %v222_v39 = vrot.slane %v219_v38, 7  ;;  %v218_v40 = vld [vmem:[%s1383_s0 + $0x2] sm:$0x1]  ;;  %v1040_v46 = vld [vmem:[%s1381_s1 + $0x68] sm:$0xff]  }
   0x8   :  { %944 = vmatprep.subr.bf16.mxu0 %v1055_v0  ;;  %955 = vmatpush3.bf16.msra.mxu1 %v1032_v12  ;;  %v1039_v45 = vld [vmem:[%s1381_s1 + $0x60] sm:$0xff]   ;;  %v1041_v47 = vld [vmem:[%s1381_s1 + $0x70] sm:$0xff]   ;;  %v1042_v48 = vld [vmem:[%s1381_s1 + $0x78] sm:$0xff]  }
   0x9   :  { %956 = vmatprep.subr.bf16.mxu1 %v1055_v0  ;;  %v223_v41 = vsel %vm28_vm2, %v222_v39, %v218_v40  ;;  %v829_v49 = vld [vmem:[%s1384_s2 + $0x2] ss:$0 sm:$0xff]  ;;  %v315_v55 = vld [vmem:[%s1383_s0 + $0xb] sm:$0x1]  ;;  %v314_v57 = vld [vmem:[%s1383_s0 + $0x3] sm:$0x1] }
   0xa   :  { %v318_v56 = vrot.slane %v315_v55, 7  ;;  %v1043_v62 = vld [vmem:[%s1381_s1 + $0x80] sm:$0xff]   ;;  %v1044_v63 = vld [vmem:[%s1381_s1 + $0x88] sm:$0xff]   ;;  %v1045_v1 = vld [vmem:[%s1381_s1 + $0x90] sm:$0xff]  }
   0xb   :  { %945 = vmatpush3.bf16.msra.mxu0 %v1029_v5  ;;  %v1046_v2 = vld [vmem:[%s1381_s1 + $0x98] sm:$0xff]   ;;  %v843_v3 = vld [vmem:[%s1384_s2 + $0x3] ss:$0 sm:$0xff]  ;;  %v410_v11 = vld [vmem:[%s1383_s0 + $0x4] sm:$0x1] }
   0xc   :  { %946 = vmatprep.subr.bf16.mxu0 %v1055_v0  ;;  %957 = vmatpush3.bf16.msra.mxu1 %v1033_v13  ;;  %v319_v58 = vsel %vm28_vm2, %v318_v56, %v314_v57  ;;  %v699_v55 = vld [vmem:[%s1383_s0 + $0xf] sm:$0x1]  ;;  %v698_v57 = vld [vmem:[%s1383_s0 + $0x7] sm:$0x1] }
   0xd   :  { %v33_v9 = vld [vmem:[%s1382_s3] sm:$0x3]  ;;  %958 = vmatprep.subr.bf16.mxu1 %v1055_v0  ;;  %v702_v56 = vrot.slane %v699_v55, 7 }
   0xe   :  { %v34_v10 = vpack.c.bf16 %v33_v9, %v33_v9  ;;  %v411_v9 = vld [vmem:[%s1383_s0 + $0xc] sm:$0x1] }
   0xf   :  { %947 = vmatpush3.bf16.msra.mxu0 %v1030_v8 }
  0x10   :  { %964 = vmatprep.subr.bf16.mxu0 %v1055_v0  ;;  %959 = vmatpush3.bf16.msra.mxu1 %v1034_v14 }
  0x11   :  { %976 = vmatprep.subr.bf16.mxu1 %v1055_v0 }
  0x12   :  { %949 = vmatmul.mubr.msk.bf16.vlgmr.msra.gmra.mrb[0].mxu0 %vm72_vm4, %v34_v10  ;;  %v414_v10 = vrot.slane %v411_v9, 7 }
  0x13   :  { %972 = vmatprep.mubr.msk.bf16.mxu0 %vm1056_vm1, %v1055_v0  ;;  %965 = vmatpush3.bf16.msra.mxu0 %v1035_v28  ;;  %v506_v28 = vld [vmem:[%s1383_s0 + $0x5] sm:$0x1] }
  0x14   :  { %966 = vmatprep.subr.bf16.mxu0 %v1055_v0  ;;  %v415_v12 = vsel %vm28_vm2, %v414_v10, %v410_v11 }
  0x17   :  { %967 = vmatpush3.bf16.msra.mxu0 %v1036_v29 }
  0x18   :  { %968 = vmatprep.subr.bf16.mxu0 %v1055_v0 }
  0x1b   :  { %969 = vmatpush3.bf16.msra.mxu0 %v1037_v30 }
  0x1c   :  { %970 = vmatprep.subr.bf16.mxu0 %v1055_v0 }
  0x1f   :  { %971 = vmatpush3.bf16.msra.mxu0 %v1038_v31 }
  0x20   :  { %988 = vmatprep.subr.bf16.mxu0 %v1055_v0 }
  0xe5   :  { %v110_v16 = vpop.f32.mrb[0].mxu0 }
  0xe6   :  { %v111_v17 = vadd.f32 %v801_v15, %v110_v16  ;;  %v950_v18 = vpop.f32.mrb[1].mxu0  ;;  %v1047_v16 = vld [vmem:[%s1381_s1 + $0xa0] sm:$0xff]  }
  0xe7   :  { %v113_v19 = vpop.f32.mrb[2].mxu0  ;;  %v1049_v18 = vld [vmem:[%s1381_s1 + $0xb0] sm:$0xff]  }
  0xe8   :  { %117 = vrot.lane.b32.xlu0 %v111_v17, %s1057_s13  ;;  %v951_v20 = vpop.f32.mrb[3].mxu0  ;;  %v1048_v17 = vld [vmem:[%s1381_s1 + $0xa8] sm:$0xff]   ;;  %v1050_v19 = vld [vmem:[%s1381_s1 + $0xb8] sm:$0xff]  }
  0xe9   :  { %v857_v20 = vld [vmem:[%s1384_s2 + $0x4] ss:$0 sm:$0xff] }
 0x15a   :  { %v118_v25 = vpop.permute.xlu0 %117 }
 0x15b   :  { %121 = vst.msk [vmem:[%s1382_s3] sm:$0x3] %vm21_vm0, %v118_v25 }
 0x15c   :  { %129 = vst.msk [vmem:[%s1382_s3] sm:$0x3] %vm31_vm3, %v127_v24 }
 0x163   :  { %v130_v26 = vld [vmem:[%s1382_s3] sm:$0x3] }
 0x164   :  { %v131_v27 = vpack.c.bf16 %v130_v26, %v130_v26  ;;  %v507_v26 = vld [vmem:[%s1383_s0 + $0xd] sm:$0x1] }
 0x166   :  { %961 = vmatmul.mubr.msk.bf16.vlgmr.msra.gmra.mrb[0].mxu1 %vm72_vm4, %v131_v27  ;;  %v510_v27 = vrot.slane %v507_v26, 7 }
 0x167   :  { %984 = vmatprep.mubr.msk.bf16.mxu1 %vm1056_vm1, %v1055_v0  ;;  %977 = vmatpush3.bf16.msra.mxu1 %v1039_v45 }
 0x168   :  { %978 = vmatprep.subr.bf16.mxu1 %v1055_v0  ;;  %v511_v29 = vsel %vm28_vm2, %v510_v27, %v506_v28 }
 0x16b   :  { %979 = vmatpush3.bf16.msra.mxu1 %v1040_v46 }
 0x16c   :  { %980 = vmatprep.subr.bf16.mxu1 %v1055_v0 }
 0x16f   :  { %981 = vmatpush3.bf16.msra.mxu1 %v1041_v47 }
 0x170   :  { %982 = vmatprep.subr.bf16.mxu1 %v1055_v0 }
 0x173   :  { %983 = vmatpush3.bf16.msra.mxu1 %v1042_v48 }
 0x174   :  { %1000 = vmatprep.subr.bf16.mxu1 %v1055_v0 }
 0x239   :  { %v207_v33 = vpop.f32.mrb[0].mxu1 }
 0x23a   :  { %v208_v34 = vadd.f32 %v815_v32, %v207_v33  ;;  %v962_v35 = vpop.f32.mrb[1].mxu1  ;;  %v1051_v33 = vld [vmem:[%s1381_s1 + $0xc0] sm:$0xff]  }
 0x23b   :  { %v210_v36 = vpop.f32.mrb[2].mxu1  ;;  %v1053_v35 = vld [vmem:[%s1381_s1 + $0xd0] sm:$0xff]  }
 0x23c   :  { %214 = vrot.lane.b32.xlu0 %v208_v34, %s1057_s13  ;;  %v963_v37 = vpop.f32.mrb[3].mxu1  ;;  %v1052_v34 = vld [vmem:[%s1381_s1 + $0xc8] sm:$0xff]   ;;  %v1054_v36 = vld [vmem:[%s1381_s1 + $0xd8] sm:$0xff]  }
 0x23d   :  { %v871_v37 = vld [vmem:[%s1384_s2 + $0x5] ss:$0 sm:$0xff] }
 0x2ae   :  { %v215_v42 = vpop.permute.xlu0 %214 }
 0x2af   :  { %217 = vst.msk [vmem:[%s1382_s3] sm:$0x3] %vm21_vm0, %v215_v42 }
 0x2b0   :  { %225 = vst.msk [vmem:[%s1382_s3] sm:$0x3] %vm31_vm3, %v223_v41 }
 0x2b7   :  { %v226_v43 = vld [vmem:[%s1382_s3] sm:$0x3] }
 0x2b8   :  { %v227_v44 = vpack.c.bf16 %v226_v43, %v226_v43  ;;  %v603_v43 = vld [vmem:[%s1383_s0 + $0xe] sm:$0x1] }
 0x2ba   :  { %973 = vmatmul.mubr.msk.bf16.vlgmr.msra.gmra.mrb[4].mxu0 %vm72_vm4, %v227_v44  ;;  %v606_v44 = vrot.slane %v603_v43, 7 }
 0x2bb   :  { %996 = vmatprep.mubr.msk.bf16.mxu0 %vm1056_vm1, %v1055_v0  ;;  %989 = vmatpush3.bf16.msra.mxu0 %v1043_v62 }
 0x2bc   :  { %990 = vmatprep.subr.bf16.mxu0 %v1055_v0 }
 0x2bf   :  { %991 = vmatpush3.bf16.msra.mxu0 %v1044_v63 }
 0x2c0   :  { %992 = vmatprep.subr.bf16.mxu0 %v1055_v0 }
 0x2c3   :  { %993 = vmatpush3.bf16.msra.mxu0 %v1045_v1 }
 0x2c4   :  { %994 = vmatprep.subr.bf16.mxu0 %v1055_v0 }
 0x2c7   :  { %995 = vmatpush3.bf16.msra.mxu0 %v1046_v2 }
 0x2c8   :  { %1012 = vmatprep.subr.bf16.mxu0 %v1055_v0 }
 0x38d   :  { %v303_v50 = vpop.f32.mrb[4].mxu0 }
 0x38e   :  { %v304_v51 = vadd.f32 %v829_v49, %v303_v50  ;;  %v974_v52 = vpop.f32.mrb[5].mxu0  ;;  %v885_v49 = vld [vmem:[%s1384_s2 + $0x6] ss:$0 sm:$0xff] }
 0x38f   :  { %v306_v53 = vpop.f32.mrb[6].mxu0 }
 0x390   :  { %310 = vrot.lane.b32.xlu1 %v304_v51, %s1057_s13  ;;  %v975_v54 = vpop.f32.mrb[7].mxu0 }
 0x402   :  { %v311_v59 = vpop.permute.xlu1 %310 }
 0x403   :  { %313 = vst.msk [vmem:[%s1382_s3] sm:$0x3] %vm21_vm0, %v311_v59 }
 0x404   :  { %321 = vst.msk [vmem:[%s1382_s3] sm:$0x3] %vm31_vm3, %v319_v58  ;;  %v703_v58 = vsel %vm28_vm2, %v702_v56, %v698_v57 }
 0x40b   :  { %v322_v60 = vld [vmem:[%s1382_s3] sm:$0x3] }
 0x40c   :  { %v323_v61 = vpack.c.bf16 %v322_v60, %v322_v60 }
 0x40e   :  { %985 = vmatmul.mubr.msk.bf16.vlgmr.msra.gmra.mrb[4].mxu1 %vm72_vm4, %v323_v61 }
 0x40f   :  { %1008 = vmatprep.mubr.msk.bf16.mxu1 %vm1056_vm1, %v1055_v0  ;;  %1001 = vmatpush3.bf16.msra.mxu1 %v1047_v16 }
 0x410   :  { %1002 = vmatprep.subr.bf16.mxu1 %v1055_v0 }
 0x413   :  { %1003 = vmatpush3.bf16.msra.mxu1 %v1048_v17 }
 0x414   :  { %1004 = vmatprep.subr.bf16.mxu1 %v1055_v0 }
 0x417   :  { %1005 = vmatpush3.bf16.msra.mxu1 %v1049_v18 }
 0x418   :  { %1006 = vmatprep.subr.bf16.mxu1 %v1055_v0 }
 0x41b   :  { %1007 = vmatpush3.bf16.msra.mxu1 %v1050_v19 }
 0x4e1   :  { %v399_v4 = vpop.f32.mrb[4].mxu1 }
 0x4e2   :  { %v400_v5 = vadd.f32 %v843_v3, %v399_v4  ;;  %v986_v6 = vpop.f32.mrb[5].mxu1 }
 0x4e3   :  { %v402_v7 = vpop.f32.mrb[6].mxu1 }
 0x4e4   :  { %406 = vrot.lane.b32.xlu1 %v400_v5, %s1057_s13  ;;  %v987_v8 = vpop.f32.mrb[7].mxu1 }
 0x556   :  { %v407_v13 = vpop.permute.xlu1 %406 }
 0x557   :  { %409 = vst.msk [vmem:[%s1382_s3] sm:$0x3] %vm21_vm0, %v407_v13 }
 0x558   :  { %417 = vst.msk [vmem:[%s1382_s3] sm:$0x3] %vm31_vm3, %v415_v12 }
 0x55f   :  { %v418_v14 = vld [vmem:[%s1382_s3] sm:$0x3] }
 0x560   :  { %v419_v15 = vpack.c.bf16 %v418_v14, %v418_v14 }
 0x562   :  { %997 = vmatmul.mubr.msk.bf16.vlgmr.msra.gmra.mrb[8].mxu0 %vm72_vm4, %v419_v15 }
 0x563   :  { %1020 = vmatprep.mubr.msk.bf16.mxu0 %vm1056_vm1, %v1055_v0  ;;  %1013 = vmatpush3.bf16.msra.mxu0 %v1051_v33 }
 0x564   :  { %1014 = vmatprep.subr.bf16.mxu0 %v1055_v0 }
 0x567   :  { %1015 = vmatpush3.bf16.msra.mxu0 %v1052_v34 }
 0x568   :  { %1016 = vmatprep.subr.bf16.mxu0 %v1055_v0 }
 0x56b   :  { %1017 = vmatpush3.bf16.msra.mxu0 %v1053_v35 }
 0x56c   :  { %1018 = vmatprep.subr.bf16.mxu0 %v1055_v0  ;;  %v602_v0 = vld [vmem:[%s1383_s0 + $0x6] sm:$0x1] }
 0x56d   :  { %v607_v45 = vsel %vm28_vm2, %v606_v44, %v602_v0 }
 0x56f   :  { %1019 = vmatpush3.bf16.msra.mxu0 %v1054_v36 }
 0x635   :  { %v495_v21 = vpop.f32.mrb[8].mxu0 }
 0x636   :  { %v496_v22 = vadd.f32 %v857_v20, %v495_v21  ;;  %v998_v23 = vpop.f32.mrb[9].mxu0 }
 0x637   :  { %v498_v24 = vpop.f32.mrb[10].mxu0 }
 0x638   :  { %502 = vrot.lane.b32.xlu0 %v496_v22, %s1057_s13  ;;  %v999_v25 = vpop.f32.mrb[11].mxu0 }
 0x6aa   :  { %v503_v30 = vpop.permute.xlu0 %502 }
 0x6ab   :  { %505 = vst.msk [vmem:[%s1382_s3] sm:$0x3] %vm21_vm0, %v503_v30 }
 0x6ac   :  { %513 = vst.msk [vmem:[%s1382_s3] sm:$0x3] %vm31_vm3, %v511_v29 }
 0x6b3   :  { %v514_v31 = vld [vmem:[%s1382_s3] sm:$0x3] }
 0x6b4   :  { %v515_v32 = vpack.c.bf16 %v514_v31, %v514_v31 }
 0x6b6   :  { %1009 = vmatmul.mubr.msk.bf16.vlgmr.msra.gmra.mrb[8].mxu1 %vm72_vm4, %v515_v32 }
 0x789   :  { %v591_v38 = vpop.f32.mrb[8].mxu1 }
 0x78a   :  { %v592_v39 = vadd.f32 %v871_v37, %v591_v38  ;;  %v1010_v40 = vpop.f32.mrb[9].mxu1 }
 0x78b   :  { %v594_v41 = vpop.f32.mrb[10].mxu1 }
 0x78c   :  { %598 = vrot.lane.b32.xlu1 %v592_v39, %s1057_s13  ;;  %v1011_v42 = vpop.f32.mrb[11].mxu1 }
 0x7fe   :  { %v599_v46 = vpop.permute.xlu1 %598 }
 0x7ff   :  { %601 = vst.msk [vmem:[%s1382_s3] sm:$0x3] %vm21_vm0, %v599_v46 }
 0x800   :  { %609 = vst.msk [vmem:[%s1382_s3] sm:$0x3] %vm31_vm3, %v607_v45 }
 0x807   :  { %v610_v47 = vld [vmem:[%s1382_s3] sm:$0x3] }
 0x808   :  { %v611_v48 = vpack.c.bf16 %v610_v47, %v610_v47 }
 0x80a   :  { %1021 = vmatmul.mubr.msk.bf16.vlgmr.msra.gmra.mrb[12].mxu0 %vm72_vm4, %v611_v48 }
 0x8dd   :  { %v687_v50 = vpop.f32.mrb[12].mxu0 }
 0x8de   :  { %v688_v51 = vadd.f32 %v885_v49, %v687_v50  ;;  %v1022_v52 = vpop.f32.mrb[13].mxu0 }
 0x8df   :  { %v690_v53 = vpop.f32.mrb[14].mxu0 }
 0x8e0   :  { %694 = vrot.lane.b32.xlu0 %v688_v51, %s1057_s13  ;;  %v1023_v54 = vpop.f32.mrb[15].mxu0 }
 0x952   :  { %v695_v59 = vpop.permute.xlu0 %694 }
 0x953   :  { %697 = vst.msk [vmem:[%s1382_s3] sm:$0x3] %vm21_vm0, %v695_v59 }
 0x954   :  { %705 = vst.msk [vmem:[%s1382_s3] sm:$0x3] %vm31_vm3, %v703_v58 }

</bundles_post_ra>
